<compile_context>
chip_gen: v7x
topology: tpu7x:2x2x1
jax: 0.10.0
libtpu: 0.0.40
codegen_flags: <defaults>
</compile_context>

<pallas_src>
import numpy as np

import jax
import jax.numpy as jnp
from jax import lax
from jax.experimental import pallas as pl
from jax.experimental.pallas import tpu as pltpu


# ----------------------------------------------------------------------------
# Wrapper-side parameter preparation (plain JAX, done once per call)
# ----------------------------------------------------------------------------
def _direct_norm(w, kind, lip_const):
    """monotonicnetworks.direct_norm semantics.  w: (out, in) PyTorch layout.

    The PyTorch LipschitzNet passes `lip_const` unchanged to every
    LipschitzLinear, so the full constant is applied per layer here too.
    """
    absw = jnp.abs(w)
    if kind == "one":            # induced L1 norm -> per input-column sums
        norms = jnp.sum(absw, axis=0, keepdims=True)      # (1, in)
    elif kind == "inf":          # induced Linf norm -> per output-row sums
        norms = jnp.sum(absw, axis=1, keepdims=True)      # (out, 1)
    elif kind == "one-inf":      # elementwise
        norms = absw
    else:
        raise ValueError(f"unsupported lip kind: {kind}")
    scale = jnp.maximum(jnp.ones_like(norms), norms / lip_const)
    return w / scale


def _layer_kinds(lip_kind, n_hidden):
    """Mirror LipschitzNet._build_model's layer_kinds construction."""
    if lip_kind in ("one-inf", "default"):
        return ["one-inf"] + ["inf"] * n_hidden
    if lip_kind in ("one", "inf"):
        return [lip_kind] * (n_hidden + 1)
    if lip_kind == "nominal":
        return ["one-inf"] + ["inf"] * (n_hidden - 1) + ["one"]
    raise ValueError(f"unsupported lip_kind: {lip_kind}")


def _round_up(n, m):
    return ((n + m - 1) // m) * m


def _choose_tile_b(batch, requested):
    """Multiple of 128, <= padded batch, and >= 2 grid steps when possible
    (so v7x's two TensorCores both get work under 'parallel' semantics)."""
    b128 = _round_up(max(int(batch), 1), 128)
    tb = max(128, _round_up(int(requested), 128))
    tb = min(tb, b128)
    if b128 >= 256 and tb > b128 // 2:
        tb = max(128, ((b128 // 2) // 128) * 128)
    return tb


def _estimate_vmem_bytes(tile_b, d_in, hidden_dims, flat_params, in_bytes):
    """Conservative VMEM footprint estimate for the budget check."""
    x_tile = 2 * tile_b * _round_up(max(d_in, 1), 128) * in_bytes   # 2 bufs
    out_tile = 2 * tile_b * 4
    max_w = max(hidden_dims) if hidden_dims else 1
    acts = (3 * 4 + in_bytes) * max_w * tile_b       # ~3 f32 live acts + cast
    params = 2 * sum(int(np.prod(a.shape)) * a.dtype.itemsize
                     for a in flat_params)
    return x_tile + out_tile + acts + params


# ----------------------------------------------------------------------------
# Fused forward kernel (one batch tile per grid step)
# ----------------------------------------------------------------------------
def _make_kernel(n_layers, half_dims, compute_dtype):
    """half_dims[i] = hidden layer i's width // 2 (static)."""
    n_hidden = n_layers - 1

    def _group_sort(z, half):
        # Rows were reordered evens-then-odds in the wrapper, so GroupSort is
        # a contiguous half-vs-half VPU min/max (sublane-aligned: half % 8==0).
        lo = jnp.minimum(z[:half, :], z[half:, :])
        hi = jnp.maximum(z[:half, :], z[half:, :])
        return lo, hi

    def kernel(x_ref, *refs):
        o_ref = refs[-1]
        p = refs[:-1]
        idx = 0

        # Layer 0 consumes the (TILE_B, d_in) x block directly via an NT
        # contraction -> no wrapper transpose/pad and no in-kernel transpose.
        w0 = p[idx][...]                                 # (d0, d_in) cdt
        b0 = p[idx + 1][...]                             # (d0, 1)    f32
        idx += 2
        z = lax.dot_general(
            w0, x_ref[...],
            dimension_numbers=(((1,), (1,)), ((), ())),
            preferred_element_type=jnp.float32) + b0     # (d0, TILE_B) f32

        if n_hidden == 0:                                # degenerate 1-layer net
            o_ref[...] = z.astype(o_ref.dtype)
            return

        lo, hi = _group_sort(z, half_dims[0])

        # Hidden layers 1..n_hidden-1: weights were split into even/odd column
        # halves in the wrapper, so (lo, hi) is consumed by two matmuls and no
        # activation concat is ever materialized.
        for i in range(1, n_hidden):
            w_e = p[idx][...]                            # (d_i, half_{i-1}) cdt
            w_o = p[idx + 1][...]                        # (d_i, half_{i-1}) cdt
            b = p[idx + 2][...]                          # (d_i, 1)          f32
            idx += 3
            z = (jnp.dot(w_e, lo.astype(compute_dtype),
                         preferred_element_type=jnp.float32)
                 + jnp.dot(w_o, hi.astype(compute_dtype),
                           preferred_element_type=jnp.float32)
                 + b)
            lo, hi = _group_sort(z, half_dims[i])

        # Final (d -> 1) layer: f32 VPU broadcast-multiply + sublane reduce
        # instead of an MXU matmul with a single useful row.
        w_e = p[idx][...]                                # (half_last, 1) f32
        w_o = p[idx + 1][...]                            # (half_last, 1) f32
        b = p[idx + 2][...]                              # (1, 1)         f32
        y = (jnp.sum(w_e * lo, axis=0, keepdims=True)
             + jnp.sum(w_o * hi, axis=0, keepdims=True)
             + b)                                        # (1, TILE_B)
        o_ref[...] = y.astype(o_ref.dtype)

    return kernel


# ----------------------------------------------------------------------------
# Public wrapper
# ----------------------------------------------------------------------------
def lipschitz_net_forward(x, weights, biases, lip_kind="one", lip_const=1.0,
                          tile_b=2048, compute_dtype=jnp.bfloat16):
    """Forward pass of LipschitzNet (monotonic=False path).

    x:        (B, input_dim) float32
    weights:  list of (out_i, in_i) arrays (PyTorch nn.Linear layout)
    biases:   list of (out_i,) arrays
    returns:  (B, 1) float32
    """
    n_layers = len(weights)
    assert n_layers >= 1 and len(biases) == n_layers
    n_hidden = n_layers - 1
    kinds = _layer_kinds(lip_kind, n_hidden)

    B, d_in = x.shape
    out_dims = [int(w.shape[0]) for w in weights]
    assert out_dims[-1] == 1, "final LipschitzLinear must have 1 output"
    for d in out_dims[:-1]:
        assert d % 2 == 0, "GroupSort (group size 2) requires even hidden dims"
        assert d % 16 == 0, ("hidden widths must be multiples of 16 so the "
                             "GroupSort half-splits stay (8,128)-tile aligned")

    compute_dtype = jnp.dtype(compute_dtype)

    # --- normalize, fold GroupSort layout into weights, split even/odd cols --
    flat = []
    for i in range(n_layers):
        w = _direct_norm(weights[i].astype(jnp.float32), kinds[i],
                         float(lip_const))
        b = biases[i].astype(jnp.float32)
        if i < n_layers - 1:
            # produce side: evens-then-odds row order so GroupSort is a
            # contiguous half-vs-half min/max
            w = jnp.concatenate([w[0::2, :], w[1::2, :]], axis=0)
            b = jnp.concatenate([b[0::2], b[1::2]])
        if i == 0:
            flat.append(w.astype(compute_dtype))               # (d0, d_in)
            flat.append(b.reshape(-1, 1))                      # (d0, 1) f32
        elif i < n_layers - 1:
            # consume side: even cols multiply lo, odd cols multiply hi
            flat.append(w[:, 0::2].astype(compute_dtype))      # (d_i, half)
            flat.append(w[:, 1::2].astype(compute_dtype))      # (d_i, half)
            flat.append(b.reshape(-1, 1))                      # (d_i, 1) f32
        else:
            # final 1-output layer stays f32 (VPU reduce, not a matmul)
            flat.append(jnp.transpose(w[:, 0::2]))             # (half, 1) f32
            flat.append(jnp.transpose(w[:, 1::2]))             # (half, 1) f32
            flat.append(b.reshape(1, 1))                       # (1, 1)   f32

    # --- batch tiling + VMEM budget ------------------------------------------
    tile_b = _choose_tile_b(B, tile_b)
    vmem_budget = 40 << 20            # headroom under v7x's 64 MiB physical VMEM
    est = _estimate_vmem_bytes(tile_b, d_in, out_dims[:-1], flat,
                               compute_dtype.itemsize)
    while tile_b > 128 and est > vmem_budget:
        tile_b = max(128, ((tile_b // 2) // 128) * 128)
        est = _estimate_vmem_bytes(tile_b, d_in, out_dims[:-1], flat,
                                   compute_dtype.itemsize)

    n_tiles = pl.cdiv(B, tile_b)

    # In a larger jitted graph this cast fuses with x's producer; pass
    # compute_dtype=jnp.float32 (or pre-cast x) to skip it entirely.
    x_c = x.astype(compute_dtype)

    in_specs = [pl.BlockSpec((tile_b, d_in), lambda i: (i, 0))]
    for a in flat:                      # params: VMEM-resident, constant index
        in_specs.append(pl.BlockSpec(tuple(a.shape), lambda i: (0, 0)))
    out_specs = pl.BlockSpec((1, tile_b), lambda i: (0, i))   # lane-dense store

    kernel = _make_kernel(n_layers, tuple(d // 2 for d in out_dims[:-1]),
                          compute_dtype)

    cp_kwargs = dict(dimension_semantics=("parallel",))
    if est > (16 << 20):                # only raise the scoped limit if needed
        cp_kwargs["vmem_limit_bytes"] = int(
            min(vmem_budget, _round_up(est, 1 << 20) + (8 << 20)))

    out = pl.pallas_call(
        kernel,
        out_shape=jax.ShapeDtypeStruct((1, B), jnp.float32),
        grid=(n_tiles,),
        in_specs=in_specs,
        out_specs=out_specs,
        compiler_params=pltpu.CompilerParams(**cp_kwargs),
    )(x_c, *flat)

    return out.reshape(B, 1)


# ----------------------------------------------------------------------------
# Pure-JAX reference (for correctness checking)
# ----------------------------------------------------------------------------
def _reference_forward(x, weights, biases, lip_kind, lip_const):
    n_layers = len(weights)
    kinds = _layer_kinds(lip_kind, n_layers - 1)
    h = x.astype(jnp.float32)
    for i, (w, b) in enumerate(zip(weights, biases)):
        w_n = _direct_norm(w.astype(jnp.float32), kinds[i], float(lip_const))
        h = h @ w_n.T + b.reshape(1, -1)
        if i < n_layers - 1:
            bsz, d = h.shape
            h = jnp.sort(h.reshape(bsz, d // 2, 2), axis=-1).reshape(bsz, d)
    return h


# ----------------------------------------------------------------------------
# Main
# ----------------------------------------------------------------------------
if __name__ == "__main__":
    key = jax.random.PRNGKey(0)

    # Small shapes consistent with the module: input_dim features, two hidden
    # LipschitzLinear+GroupSort layers, 1-unit output.  B=300 exercises the
    # batch grid (3 steps at tile_b=128) and the ragged last block.
    B = 300
    input_dim = 16
    layer_dims = [32, 32]
    lip_const = 1.0
    lip_kind = "one"                                   # module default

    dims = [input_dim] + layer_dims + [1]
    weights, biases = [], []
    for i in range(len(dims) - 1):
        key, kw, kb = jax.random.split(key, 3)
        fan_in, fan_out = dims[i], dims[i + 1]
        bound = 1.0 / (fan_in ** 0.5)                  # deterministic, Linear-like init
        weights.append(
            jax.random.uniform(kw, (fan_out, fan_in), jnp.float32, -bound, bound))
        biases.append(
            jax.random.uniform(kb, (fan_out,), jnp.float32, -bound, bound))

    key, kx = jax.random.split(key)
    x = jax.random.normal(kx, (B, input_dim), jnp.float32)

    y_ref = _reference_forward(x, weights, biases, lip_kind, lip_const)

    # f32 path: tight check against the pure-JAX reference.
    y32 = lipschitz_net_forward(x, weights, biases, lip_kind=lip_kind,
                                lip_const=lip_const, compute_dtype=jnp.float32)
    y32 = jax.block_until_ready(y32)
    assert y32.shape == (B, 1), y32.shape
    assert jnp.allclose(y32, y_ref, atol=1e-4, rtol=1e-4), (
        float(jnp.max(jnp.abs(y32 - y_ref))))

    # Default bf16-stream path (halved HBM traffic); looser tolerance.
    y16 = lipschitz_net_forward(x, weights, biases, lip_kind=lip_kind,
                                lip_const=lip_const)
    y16 = jax.block_until_ready(y16)
    assert y16.shape == (B, 1), y16.shape
    assert jnp.allclose(y16, y_ref, atol=5e-2, rtol=5e-2), (
        float(jnp.max(jnp.abs(y16 - y_ref))))

    print("KERNEL_OK")
</pallas_src>

<mosaic_0001>
module attributes {stable_mosaic.version = 11 : i64} {
  func.func @kernel(%arg0: i32, %arg1: memref<128x16xf32, #tpu.memory_space<vmem>>, %arg2: memref<32x16xf32, #tpu.memory_space<vmem>>, %arg3: memref<32x1xf32, #tpu.memory_space<vmem>>, %arg4: memref<32x16xf32, #tpu.memory_space<vmem>>, %arg5: memref<32x16xf32, #tpu.memory_space<vmem>>, %arg6: memref<32x1xf32, #tpu.memory_space<vmem>>, %arg7: memref<16x1xf32, #tpu.memory_space<vmem>>, %arg8: memref<16x1xf32, #tpu.memory_space<vmem>>, %arg9: memref<1x1xf32, #tpu.memory_space<vmem>>, %arg10: memref<1x128xf32, #tpu.memory_space<vmem>>) attributes {dimension_semantics = [#tpu.dimension_semantics<parallel>], iteration_bounds = array<i64: 3>, scalar_prefetch = 0 : i64, scratch_operands = 0 : i64, tpu.core_type = #tpu.core_type<tc>, window_params = [{transform_indices = @transform_0, window_bounds = array<i64: 128, 16>}, {pipeline_mode = #tpu.pipeline_mode<synchronous>, transform_indices = @transform_1, window_bounds = array<i64: 32, 16>}, {pipeline_mode = #tpu.pipeline_mode<synchronous>, transform_indices = @transform_2, window_bounds = array<i64: 32, 1>}, {pipeline_mode = #tpu.pipeline_mode<synchronous>, transform_indices = @transform_3, window_bounds = array<i64: 32, 16>}, {pipeline_mode = #tpu.pipeline_mode<synchronous>, transform_indices = @transform_4, window_bounds = array<i64: 32, 16>}, {pipeline_mode = #tpu.pipeline_mode<synchronous>, transform_indices = @transform_5, window_bounds = array<i64: 32, 1>}, {pipeline_mode = #tpu.pipeline_mode<synchronous>, transform_indices = @transform_6, window_bounds = array<i64: 16, 1>}, {pipeline_mode = #tpu.pipeline_mode<synchronous>, transform_indices = @transform_7, window_bounds = array<i64: 16, 1>}, {pipeline_mode = #tpu.pipeline_mode<synchronous>, transform_indices = @transform_8, window_bounds = array<i64: 1, 1>}, {transform_indices = @transform_9, window_bounds = array<i64: 1, 128>}]} {
    %c0 = arith.constant 0 : index
    %c0_0 = arith.constant 0 : index
    %0 = vector.load %arg2[%c0, %c0_0] : memref<32x16xf32, #tpu.memory_space<vmem>>, vector<32x16xf32>
    %c0_1 = arith.constant 0 : index
    %c0_2 = arith.constant 0 : index
    %1 = vector.load %arg3[%c0_1, %c0_2] : memref<32x1xf32, #tpu.memory_space<vmem>>, vector<32x1xf32>
    %c0_3 = arith.constant 0 : index
    %c0_4 = arith.constant 0 : index
    %2 = vector.load %arg1[%c0_3, %c0_4] : memref<128x16xf32, #tpu.memory_space<vmem>>, vector<128x16xf32>
    %cst = arith.constant dense<0.000000e+00> : vector<32x128xf32>
    %3 = tpu.matmul %0, %2, %cst {dimension_numbers = #tpu.dot_dimension_numbers<[1], [1], [0], [0], [0, 0, 1, 0], [], []>} : vector<32x16xf32>, vector<128x16xf32>, vector<32x128xf32> -> vector<32x128xf32>
    %4 = vector.broadcast %1 : vector<32x1xf32> to vector<32x128xf32>
    %5 = arith.addf %3, %4 : vector<32x128xf32>
    %6 = vector.extract_strided_slice %5 {offsets = [0, 0], sizes = [16, 128], strides = [1, 1]} : vector<32x128xf32> to vector<16x128xf32>
    %7 = vector.extract_strided_slice %5 {offsets = [16, 0], sizes = [16, 128], strides = [1, 1]} : vector<32x128xf32> to vector<16x128xf32>
    %8 = arith.minimumf %6, %7 : vector<16x128xf32>
    %9 = vector.extract_strided_slice %5 {offsets = [0, 0], sizes = [16, 128], strides = [1, 1]} : vector<32x128xf32> to vector<16x128xf32>
    %10 = vector.extract_strided_slice %5 {offsets = [16, 0], sizes = [16, 128], strides = [1, 1]} : vector<32x128xf32> to vector<16x128xf32>
    %11 = arith.maximumf %9, %10 : vector<16x128xf32>
    %c0_5 = arith.constant 0 : index
    %c0_6 = arith.constant 0 : index
    %12 = vector.load %arg4[%c0_5, %c0_6] : memref<32x16xf32, #tpu.memory_space<vmem>>, vector<32x16xf32>
    %c0_7 = arith.constant 0 : index
    %c0_8 = arith.constant 0 : index
    %13 = vector.load %arg5[%c0_7, %c0_8] : memref<32x16xf32, #tpu.memory_space<vmem>>, vector<32x16xf32>
    %c0_9 = arith.constant 0 : index
    %c0_10 = arith.constant 0 : index
    %14 = vector.load %arg6[%c0_9, %c0_10] : memref<32x1xf32, #tpu.memory_space<vmem>>, vector<32x1xf32>
    %cst_11 = arith.constant dense<0.000000e+00> : vector<32x128xf32>
    %15 = tpu.matmul %12, %8, %cst_11 {dimension_numbers = #tpu.dot_dimension_numbers<[1], [0], [0], [1], [0, 0, 1, 1], [], []>} : vector<32x16xf32>, vector<16x128xf32>, vector<32x128xf32> -> vector<32x128xf32>
    %cst_12 = arith.constant dense<0.000000e+00> : vector<32x128xf32>
    %16 = tpu.matmul %13, %11, %cst_12 {dimension_numbers = #tpu.dot_dimension_numbers<[1], [0], [0], [1], [0, 0, 1, 1], [], []>} : vector<32x16xf32>, vector<16x128xf32>, vector<32x128xf32> -> vector<32x128xf32>
    %17 = arith.addf %15, %16 : vector<32x128xf32>
    %18 = vector.broadcast %14 : vector<32x1xf32> to vector<32x128xf32>
    %19 = arith.addf %17, %18 : vector<32x128xf32>
    %20 = vector.extract_strided_slice %19 {offsets = [0, 0], sizes = [16, 128], strides = [1, 1]} : vector<32x128xf32> to vector<16x128xf32>
    %21 = vector.extract_strided_slice %19 {offsets = [16, 0], sizes = [16, 128], strides = [1, 1]} : vector<32x128xf32> to vector<16x128xf32>
    %22 = arith.minimumf %20, %21 : vector<16x128xf32>
    %23 = vector.extract_strided_slice %19 {offsets = [0, 0], sizes = [16, 128], strides = [1, 1]} : vector<32x128xf32> to vector<16x128xf32>
    %24 = vector.extract_strided_slice %19 {offsets = [16, 0], sizes = [16, 128], strides = [1, 1]} : vector<32x128xf32> to vector<16x128xf32>
    %25 = arith.maximumf %23, %24 : vector<16x128xf32>
    %c0_13 = arith.constant 0 : index
    %c0_14 = arith.constant 0 : index
    %26 = vector.load %arg7[%c0_13, %c0_14] : memref<16x1xf32, #tpu.memory_space<vmem>>, vector<16x1xf32>
    %c0_15 = arith.constant 0 : index
    %c0_16 = arith.constant 0 : index
    %27 = vector.load %arg8[%c0_15, %c0_16] : memref<16x1xf32, #tpu.memory_space<vmem>>, vector<16x1xf32>
    %c0_17 = arith.constant 0 : index
    %c0_18 = arith.constant 0 : index
    %28 = vector.load %arg9[%c0_17, %c0_18] : memref<1x1xf32, #tpu.memory_space<vmem>>, vector<1x1xf32>
    %29 = vector.broadcast %26 : vector<16x1xf32> to vector<16x128xf32>
    %30 = arith.mulf %29, %22 : vector<16x128xf32>
    %cst_19 = arith.constant dense<0.000000e+00> : vector<128xf32>
    %31 = vector.multi_reduction <add>, %30, %cst_19 [0] : vector<16x128xf32> to vector<128xf32>
    %32 = vector.shape_cast %31 : vector<128xf32> to vector<1x128xf32>
    %33 = vector.broadcast %27 : vector<16x1xf32> to vector<16x128xf32>
    %34 = arith.mulf %33, %25 : vector<16x128xf32>
    %cst_20 = arith.constant dense<0.000000e+00> : vector<128xf32>
    %35 = vector.multi_reduction <add>, %34, %cst_20 [0] : vector<16x128xf32> to vector<128xf32>
    %36 = vector.shape_cast %35 : vector<128xf32> to vector<1x128xf32>
    %37 = arith.addf %32, %36 : vector<1x128xf32>
    %38 = vector.broadcast %28 : vector<1x1xf32> to vector<1x128xf32>
    %39 = arith.addf %37, %38 : vector<1x128xf32>
    %c0_21 = arith.constant 0 : index
    %c0_22 = arith.constant 0 : index
    %40 = vector.load %arg10[%c0_21, %c0_22] : memref<1x128xf32, #tpu.memory_space<vmem>>, vector<1x128xf32>
    tpu.vector_store %arg10[%c0_21, %c0_22], %39 {strides = array<i32>} : memref<1x128xf32, #tpu.memory_space<vmem>>, vector<1x128xf32>,
    return
  }
  func.func @transform_0(%arg0: i32) -> (i32, i32) {
    %c0_i32 = arith.constant 0 : i32
    %c0_i32_0 = arith.constant 0 : i32
    return %arg0, %c0_i32 : i32, i32
  }
  func.func @transform_1(%arg0: i32) -> (i32, i32) {
    %c0_i32 = arith.constant 0 : i32
    %c0_i32_0 = arith.constant 0 : i32
    %c0_i32_1 = arith.constant 0 : i32
    return %c0_i32, %c0_i32_0 : i32, i32
  }
  func.func @transform_2(%arg0: i32) -> (i32, i32) {
    %c0_i32 = arith.constant 0 : i32
    %c0_i32_0 = arith.constant 0 : i32
    %c0_i32_1 = arith.constant 0 : i32
    return %c0_i32, %c0_i32_0 : i32, i32
  }
  func.func @transform_3(%arg0: i32) -> (i32, i32) {
    %c0_i32 = arith.constant 0 : i32
    %c0_i32_0 = arith.constant 0 : i32
    %c0_i32_1 = arith.constant 0 : i32
    return %c0_i32, %c0_i32_0 : i32, i32
  }
  func.func @transform_4(%arg0: i32) -> (i32, i32) {
    %c0_i32 = arith.constant 0 : i32
    %c0_i32_0 = arith.constant 0 : i32
    %c0_i32_1 = arith.constant 0 : i32
    return %c0_i32, %c0_i32_0 : i32, i32
  }
  func.func @transform_5(%arg0: i32) -> (i32, i32) {
    %c0_i32 = arith.constant 0 : i32
    %c0_i32_0 = arith.constant 0 : i32
    %c0_i32_1 = arith.constant 0 : i32
    return %c0_i32, %c0_i32_0 : i32, i32
  }
  func.func @transform_6(%arg0: i32) -> (i32, i32) {
    %c0_i32 = arith.constant 0 : i32
    %c0_i32_0 = arith.constant 0 : i32
    %c0_i32_1 = arith.constant 0 : i32
    return %c0_i32, %c0_i32_0 : i32, i32
  }
  func.func @transform_7(%arg0: i32) -> (i32, i32) {
    %c0_i32 = arith.constant 0 : i32
    %c0_i32_0 = arith.constant 0 : i32
    %c0_i32_1 = arith.constant 0 : i32
    return %c0_i32, %c0_i32_0 : i32, i32
  }
  func.func @transform_8(%arg0: i32) -> (i32, i32) {
    %c0_i32 = arith.constant 0 : i32
    %c0_i32_0 = arith.constant 0 : i32
    %c0_i32_1 = arith.constant 0 : i32
    return %c0_i32, %c0_i32_0 : i32, i32
  }
  func.func @transform_9(%arg0: i32) -> (i32, i32) {
    %c0_i32 = arith.constant 0 : i32
    %c0_i32_0 = arith.constant 0 : i32
    return %c0_i32, %arg0 : i32, i32
  }
}

</mosaic_0001>

<bundles_post_ra>
// kernel: tpu_custom_call.1
= control target key start
LH: loop header
LB: loop body
LE: loop exit
PB: predicated region body
PF: predicated region fallthrough
CT: control target
= control target key end

     0   :  { %s1492_s0 = inlined_call_operand.vmem [shape: f32[300,16], index: 0, kind: input, shape index: {}]   ;;  %s1493_s1 = inlined_call_operand.vmem [shape: f32[32,16], index: 1, kind: input, shape index: {}]   ;;  %s1494_s2 = inlined_call_operand.vmem [shape: f32[32,1], index: 2, kind: input, shape index: {}]   ;;  %s1495_s3 = inlined_call_operand.vmem [shape: f32[32,16], index: 3, kind: input, shape index: {}]   ;;  %s1496_s4 = inlined_call_operand.vmem [shape: f32[32,16], index: 4, kind: input, shape index: {}]   ;;  %s1497_s5 = inlined_call_operand.vmem [shape: f32[32,1], index: 5, kind: input, shape index: {}]   ;;  %s1498_s6 = inlined_call_operand.vmem [shape: f32[16,1], index: 6, kind: input, shape index: {}]   ;;  %s1499_s7 = inlined_call_operand.vmem [shape: f32[16,1], index: 7, kind: input, shape index: {}]   ;;  %s1500_s8 = inlined_call_operand.<no memory space> [shape: f32[1,1], index: 8, kind: input, shape index: {}]   ;;  %s1501_s9 = inlined_call_operand.hbm [shape: f32[1,300], index: 9, kind: output, shape index: {}]  }
   0x1   :  { %v14_v0 = vstv %s1500_s8 }
   0x2   :  { %15 = vst [vmem:[#allocation2] sm:$0x1] %v14_v0 }
   0x3   :  { %16 = vsyncpa [#allocation4], 0 }
   0x4   :  { %18 = vsyncpa [#allocation4 + $0x1], 0  ;;  %s1253_s11 = smov 0   ;;  %s1255_s12 = smov 0  }
   0x5   :  { %s1257_s13 = smov 0   ;;  %s1259_s14 = smov 0  }
   0x6 LB: > { %s904_s8 = sadd.s32 4294967295, %s1196_s14   ;;  %s905_s15 = sadd.s32 4294967294, %s1196_s14   ;;  %s1196_s14 = sphi %s1259_s14, %s1509_s14   ;;  %s1192_s13 = sphi %s1257_s13, %s1508_s13   ;;  %s1188_s12 = sphi %s1255_s12, %s1507_s12   ;;  %s1184_s11 = sphi %s1253_s11, %s1506_s11  }
   0x7   : > { %s1276_s16 = sadd.s32 1, %s1196_s14   ;;  %s225_s17 = sadd.s32 1, %s1192_s13 }
   0x8   : > { %s222_s18 = ssub.s32 %s1196_s14, %s1276_s16  ;;  %p235_p0 = scmp.ne.s32.totalorder %s1192_s13, %s1188_s12 }
   0x9   : > { %p223_p1 = scmp.eq.s32.totalorder %s222_s18, 0  ;;  %p236_p2 = scmp.eq.s32.totalorder %s904_s8, 2 }
   0xa   : > { %p241_p3 = scmp.ne.s32.totalorder %s1188_s12, %s1184_s11  ;;  %p242_p4 = scmp.eq.s32.totalorder %s905_s15, 2 }
   0xb   : > { %s1286_s19 = scalar_select %p223_p1, %s1192_s13, %s225_s17  }
   0xc   : > { %p1288_p5 = por %p236_p2, %p235_p0  ;;  %p1292_p6 = por %p242_p4, %p241_p3 }
   0xd   : > { %p908_p7 = scmp.ge.s32.totalorder %s1196_s14, 1  ;;  %p301_p8 = scmp.lt.s32.totalorder %s1196_s14, 4 }
   0xf   : > { %p302_p9 = pnand %p908_p7, %p301_p8 }
  0x10   : > { %s1298_s22 = sshll.u32 (!%p302_p9), %s904_s8, 4  ;;  %vm398_vm0 = vcmask (!%p302_p9), 130048   ;;  %v354_v1 = vld [vmem:[%s1493_s1] sm:$0xff] (!%p302_p9)  ;;  %v1198_v2 = vmov (!%p302_p9), 0   ;;  %v360_v4 = vld [vmem:[%s1494_s2 + $0x10] sm:$0xff] (!%p302_p9)  ;;  %v359_v5 = vld [vmem:[%s1494_s2 + $0x8] sm:$0xff] (!%p302_p9) }
  0x11   : > { %305 = sbr.rel (%p302_p9) target bundleno = 585 (0x249), region = 56  ;;  %p345_p10 = scmp.lt.s32.totalorder (!%p302_p9), %s1298_s22, 37  ;;  %1006 = vmatprep.mubr.msk.f32.mxu0 (!%p302_p9), %vm398_vm0, %v354_v1  ;;  %1132 = vset.pattern.permute.xlu0 (!%p302_p9), %v1198_v2  ;;  %v358_v3 = vld [vmem:[%s1494_s2] sm:$0xff] (!%p302_p9)  ;;  %v361_v6 = vld [vmem:[%s1494_s2 + $0x18] sm:$0xff] (!%p302_p9)  ;;  %vm1325_vm1 = vmpackc.low (!%p302_p9), %vm398_vm0, %vm398_vm0 }
  0x12   : > { %380 = vperm.xlu0 (!%p302_p9), %1132, %v358_v3   ;;  %1133 = vset.pattern.permute.xlu1 (!%p302_p9), %v1198_v2  ;;  %v556_v8 = vld [vmem:[%s1497_s5] sm:$0xff] (!%p302_p9)  ;;  %v557_v14 = vld [vmem:[%s1497_s5 + $0x8] sm:$0xff] (!%p302_p9)  ;;  %v558_v16 = vld [vmem:[%s1497_s5 + $0x10] sm:$0xff] (!%p302_p9)  ;;  %s338_s25 = sand.u32 (!%p302_p9), 1, %s1188_s12   ;;  %s1450_s30 = scalar_lea.hbm (!%p302_p9), %s1501_s9, %s1298_s22 }
  0x13   : > { %390 = vperm.xlu1 (!%p302_p9), %1133, %v360_v4   ;;  %v559_v17 = vld [vmem:[%s1497_s5 + $0x18] sm:$0xff] (!%p302_p9)  ;;  %v782_v20 = vld [vmem:[%s1498_s6] sm:$0xff] (!%p302_p9)  ;;  %v783_v22 = vld [vmem:[%s1498_s6 + $0x8] sm:$0xff] (!%p302_p9)  ;;  %s339_s26 = scalar_lea.vmem (!%p302_p9), [#allocation3], %s338_s25  ;;  %s838_s10 = scalar_lea.sflag (!%p302_p9), [#allocation4], %s338_s25 }
  0x14   : > { %v784_v23 = vld [vmem:[%s1499_s7] sm:$0xff] (!%p302_p9)  ;;  %v785_v24 = vld [vmem:[%s1499_s7 + $0x8] sm:$0xff] (!%p302_p9)  ;;  %v356_v42 = vld [vmem:[%s1493_s1 + $0x10] sm:$0xff] (!%p302_p9)  ;;  %s850_s27 = sshll.u32 (!%p302_p9), %s339_s26, 4  ;;  %s1452_s27 = int_to_ptr.vmem [resolvable:$true] %s850_s27 }
  0x15   : > { %v786_v27 = vld [vmem:[#allocation2] sm:$0x1] (!%p302_p9)  ;;  %v355_v41 = vld [vmem:[%s1493_s1 + $0x8] sm:$0xff] (!%p302_p9)  ;;  %v357_v43 = vld [vmem:[%s1493_s1 + $0x18] sm:$0xff] (!%p302_p9)  ;;  %s1134_s8 = scalar_lea.vmem (!%p302_p9), %s1452_s27, 16 }
  0x16   : > { %385 = vperm.xlu0 (!%p302_p9), %1132, %v359_v5   ;;  %v552_v44 = vld [vmem:[%s1496_s4] sm:$0xff] (!%p302_p9)  ;;  %v553_v63 = vld [vmem:[%s1496_s4 + $0x8] sm:$0xff] (!%p302_p9)  ;;  %v554_v0 = vld [vmem:[%s1496_s4 + $0x10] sm:$0xff] (!%p302_p9)  ;;  %p1135_p11 = scmp.ne.s32.totalorder (!%p302_p9), %s1452_s27, %s1134_s8 }
  0x17   : > { %395 = vperm.xlu1 (!%p302_p9), %1133, %v361_v6   ;;  %1016 = vmatprep.mubr.msk.f32.mxu1 (!%p302_p9), %vm398_vm0, %v552_v44  ;;  %v555_v1 = vld [vmem:[%s1496_s4 + $0x18] sm:$0xff] (!%p302_p9)  ;;  %v548_v2 = vld [vmem:[%s1495_s3] sm:$0xff] (!%p302_p9)  ;;  %v549_v3 = vld [vmem:[%s1495_s3 + $0x8] sm:$0xff] (!%p302_p9) }
  0x18   : > { %s346_s29 = scalar_select %p345_p10, %s1298_s22, 37  ;;  %v550_v4 = vld [vmem:[%s1495_s3 + $0x10] sm:$0xff]  ;;  %v551_v5 = vld [vmem:[%s1495_s3 + $0x18] sm:$0xff] }
  0x19   : > { %p1136_p12 = pnand %p1135_p11, %p1288_p5 }
  0x1a   : > { %s910_s17 = sshll.u32 %s346_s29, 3  ;;  %756 = vperm.xlu0 %1132, %v556_v8  }
  0x1b   : > { %s1321_s24 = scalar_lea.vmem %s1492_s0, %s910_s17  ;;  %761 = vperm.xlu1 %1133, %v557_v14   ;;  %p1137_p13 = pneg %p1136_p12 }
  0x1c   : > { %v362_v9 = vld [vmem:[%s1321_s24] sm:$0xff]  ;;  %v363_v10 = vld [vmem:[%s1321_s24 + $0x8] sm:$0xff]  ;;  %v364_v11 = vld [vmem:[%s1321_s24 + $0x10] sm:$0xff] }
  0x1d   : > { %v1032_v12 = vpack.c.bf16 %v363_v10, %v362_v9  ;;  %v365_v13 = vld [vmem:[%s1321_s24 + $0x18] sm:$0xff]  ;;  %v366_v18 = vld [vmem:[%s1321_s24 + $0x20] sm:$0xff]  ;;  %v367_v19 = vld [vmem:[%s1321_s24 + $0x28] sm:$0xff] }
  0x1e   : > { %v1038_v15 = vpack.c.bf16 %v365_v13, %v364_v11  ;;  %766 = vperm.xlu0 %1132, %v558_v16   ;;  %v1044_v21 = vpack.c.bf16 %v367_v19, %v366_v18  ;;  %v368_v25 = vld [vmem:[%s1321_s24 + $0x30] sm:$0xff]  ;;  %v369_v26 = vld [vmem:[%s1321_s24 + $0x38] sm:$0xff]  ;;  %v370_v29 = vld [vmem:[%s1321_s24 + $0x40] sm:$0xff] }
  0x1f   : > { %1034 = vmatprep.subr.msk.bf16.mxu0 %vm1325_vm1, %v1032_v12  ;;  %771 = vperm.xlu1 %1133, %v559_v17   ;;  %v1050_v28 = vpack.c.bf16 %v369_v26, %v368_v25  ;;  %v371_v30 = vld [vmem:[%s1321_s24 + $0x48] sm:$0xff]  ;;  %v372_v32 = vld [vmem:[%s1321_s24 + $0x50] sm:$0xff]  ;;  %v373_v33 = vld [vmem:[%s1321_s24 + $0x58] sm:$0xff] }
  0x20   : > { %1037 = vmatpush3.bf16.xpose.msk.msra.mxu0 %vm1325_vm1, %v1032_v12  ;;  %v1056_v31 = vpack.c.bf16 %v371_v30, %v370_v29  ;;  %v1062_v34 = vpack.c.bf16 %v373_v33, %v372_v32  ;;  %v374_v35 = vld [vmem:[%s1321_s24 + $0x60] sm:$0xff]  ;;  %v375_v36 = vld [vmem:[%s1321_s24 + $0x68] sm:$0xff]  ;;  %v376_v38 = vld [vmem:[%s1321_s24 + $0x70] sm:$0xff]  ;;  %v831_v32 = vlaneseq }
  0x21   : > { %1040 = vmatprep.subr.msk.bf16.mxu0 %vm1325_vm1, %v1038_v15  ;;  %v1068_v37 = vpack.c.bf16 %v375_v36, %v374_v35  ;;  %v377_v39 = vld [vmem:[%s1321_s24 + $0x78] sm:$0xff]  ;;  %s1199_s24 = smov [#allocation3]  }
  0x22   : > { %789 = vperm.xlu0 %1132, %v782_v20   ;;  %v1074_v40 = vpack.c.bf16 %v377_v39, %v376_v38  ;;  %s1138_s15 = sshll.u32 %s1199_s24, 4  ;;  %s1139_s15 = int_to_ptr.vmem [resolvable:$false] %s1138_s15 }
  0x23   : > { %794 = vperm.xlu1 %1133, %v783_v22   ;;  %s1140_s17 = scalar_lea.vmem %s1139_s15, 32  ;;  %p1141_p0 = scmp.lt.s32.totalorder %s1452_s27, %s1139_s15 }
  0x24   : > { %p1142_p1 = scmp.lt.s32.totalorder %s1140_s17, %s1134_s8 }
  0x26   : > { %808 = vperm.xlu0 %1132, %v784_v23   ;;  %p1143_p2 = por %p1142_p1, %p1141_p0 }
  0x27   : > { %813 = vperm.xlu1 %1133, %v785_v24  }
  0x28   : > { %1043 = vmatpush3.bf16.xpose.msk.msra.mxu0 %vm1325_vm1, %v1038_v15  ;;  %p1144_p3 = pnand %p1143_p2, %p1137_p13 }
  0x29   : > { %1046 = vmatprep.subr.msk.bf16.mxu0 %vm1325_vm1, %v1044_v21 }
  0x2a   : > { %828 = vperm.xlu0 %1132, %v786_v27  }
  0x30   : > { %1049 = vmatpush3.bf16.xpose.msk.msra.mxu0 %vm1325_vm1, %v1044_v21 }
  0x31   : > { %1052 = vmatprep.subr.msk.bf16.mxu0 %vm1325_vm1, %v1050_v28 }
  0x38   : > { %1055 = vmatpush3.bf16.xpose.msk.msra.mxu0 %vm1325_vm1, %v1050_v28 }
  0x39   : > { %1058 = vmatprep.subr.msk.bf16.mxu0 %vm1325_vm1, %v1056_v31 }
  0x40   : > { %1061 = vmatpush3.bf16.xpose.msk.msra.mxu0 %vm1325_vm1, %v1056_v31 }
  0x41   : > { %1064 = vmatprep.subr.msk.bf16.mxu0 %vm1325_vm1, %v1062_v34 }
  0x48   : > { %1067 = vmatpush3.bf16.xpose.msk.msra.mxu0 %vm1325_vm1, %v1062_v34 }
  0x49   : > { %1070 = vmatprep.subr.msk.bf16.mxu0 %vm1325_vm1, %v1068_v37 }
  0x50   : > { %1073 = vmatpush3.bf16.xpose.msk.msra.mxu0 %vm1325_vm1, %v1068_v37  ;;  %v832_v37 = vshrl.u32 %v831_v32, 7 }
  0x51   : > { %1076 = vmatprep.subr.msk.bf16.mxu0 %vm1325_vm1, %v1074_v40 }
  0x58   : > { %1079 = vmatpush3.bf16.xpose.msk.msra.mxu0 %vm1325_vm1, %v1074_v40 }
  0x5f   : > { %1007 = vmatmul.mubr.msk.f32.vlgmr.msra.gmra.mrb[0].mxu0 %vm398_vm0, %v355_v41 }
  0x60   : > { %1009 = vmatprep.mubr.msk.f32.mxu0 %vm398_vm0, %v356_v42  ;;  %v833_v42 = vsub.s32 0, %v832_v37 }
  0x63   : > { %1010 = vmatmul.mubr.msk.f32.gmra.mrb[2].mxu0 %vm398_vm0, %v357_v43 }
  0x91   : > { %v381_v45 = vpop.permute.xlu0 %380 }
  0x92   : > { %v391_v46 = vpop.permute.xlu1 %390 }
  0x95   : > { %v386_v49 = vpop.permute.xlu0 %385 }
  0x96   : > { %v396_v50 = vpop.permute.xlu1 %395 }
  0x99   : > { %v757_v7 = vpop.permute.xlu0 %756 }
  0x9a   : > { %v762_v6 = vpop.permute.xlu1 %761 }
  0x9d   : > { %v767_v9 = vpop.permute.xlu0 %766 }
  0x9e   : > { %v772_v8 = vpop.permute.xlu1 %771 }
  0xa1   : > { %v790_v13 = vpop.permute.xlu0 %789 }
  0xa2   : > { %v795_v12 = vpop.permute.xlu1 %794 }
  0xa5   : > { %v809_v25 = vpop.permute.xlu0 %808 }
  0xa6   : > { %v814_v22 = vpop.permute.xlu1 %813 }
 0x132   : > { %v1008_v47 = vpop.f32.mrb[0].mxu0 }
 0x133   : > { %v525_v48 = vpop.f32.mrb[1].mxu0  ;;  %v531_v52 = vadd.f32 %v1008_v47, %v386_v49 }
 0x134   : > { %v526_v55 = vadd.f32 %v525_v48, %v381_v45  ;;  %v829_v45 = vpop.permute.xlu0 %828 }
 0x135   : > { %v834_v48 = vrot.slane %v829_v45, %v833_v42 }
 0x136   : > { %v1011_v51 = vpop.f32.mrb[2].mxu0 }
 0x137   : > { %v541_v53 = vadd.f32 %v1011_v51, %v396_v50  ;;  %v535_v54 = vpop.f32.mrb[3].mxu0 }
 0x138   : > { %v536_v56 = vadd.f32 %v535_v54, %v391_v46 }
 0x139   : > { %v545_v57 = vmin.f32 %v531_v52, %v541_v53  ;;  %v547_v58 = vmax.f32 %v531_v52, %v541_v53 }
 0x13a   : > { %v544_v59 = vmin.f32 %v526_v55, %v536_v56  ;;  %v546_v60 = vmax.f32 %v526_v55, %v536_v56 }
 0x13c   : > { %v1080_v61 = vpack.c.bf16 %v547_v58, %v546_v60  ;;  %v1084_v62 = vpack.c.bf16 %v545_v57, %v544_v59 }
 0x13e   : > { %1081 = vmatprep.subr.bf16.mxu1 %v1080_v61 }
 0x13f   : > { %1083 = vmatpush3.bf16.msra.mxu1 %v1080_v61 }
 0x140   : > { %1085 = vmatprep.subr.bf16.mxu1 %v1084_v62 }
 0x142   : > { %1017 = vmatmul.mubr.msk.f32.vlgmr.msra.gmra.mrb[0].mxu1 %vm398_vm0, %v553_v63 }
 0x143   : > { %1087 = vmatpush3.bf16.msra.mxu1 %v1084_v62  ;;  %1019 = vmatprep.mubr.msk.f32.mxu1 %vm398_vm0, %v554_v0 }
 0x146   : > { %1020 = vmatmul.mubr.msk.f32.gmra.mrb[2].mxu1 %vm398_vm0, %v555_v1 }
 0x147   : > { %1026 = vmatprep.mubr.msk.f32.mxu1 %vm398_vm0, %v548_v2 }
 0x14a   : > { %1027 = vmatmul.mubr.msk.f32.vlgmr.msra.gmra.mrb[0].mxu1 %vm398_vm0, %v549_v3 }
 0x14b   : > { %1029 = vmatprep.mubr.msk.f32.mxu1 %vm398_vm0, %v550_v4 }
 0x14e   : > { %1030 = vmatmul.mubr.msk.f32.gmra.mrb[2].mxu1 %vm398_vm0, %v551_v5 }
 0x21d   : > { %v1028_v10 = vpop.f32.mrb[0].mxu1 }
 0x21e   : > { %v735_v11 = vpop.f32.mrb[1].mxu1  ;;  %v775_v15 = vadd.f32 %v1028_v10, %v762_v6 }
 0x21f   : > { %v774_v18 = vadd.f32 %v757_v7, %v735_v11 }
 0x221   : > { %v1031_v14 = vpop.f32.mrb[2].mxu1 }
 0x222   : > { %v777_v16 = vadd.f32 %v1031_v14, %v772_v8  ;;  %v745_v17 = vpop.f32.mrb[3].mxu1 }
 0x223   : > { %v776_v19 = vadd.f32 %v767_v9, %v745_v17 }
 0x224   : > { %v779_v20 = vmin.f32 %v775_v15, %v777_v16  ;;  %v781_v21 = vmax.f32 %v775_v15, %v777_v16 }
 0x225   : > { %v778_v23 = vmin.f32 %v774_v18, %v776_v19  ;;  %v780_v24 = vmax.f32 %v774_v18, %v776_v19 }
 0x226   : > { %v798_v26 = vmul.f32 %v795_v12, %v779_v20  ;;  %v817_v27 = vmul.f32 %v814_v22, %v781_v21 }
 0x227   : > { %v797_v28 = vmul.f32 %v790_v13, %v778_v23  ;;  %v816_v29 = vmul.f32 %v809_v25, %v780_v24 }
 0x229   : > { %v799_v30 = vadd.f32 %v798_v26, %v797_v28  ;;  %v818_v31 = vadd.f32 %v817_v27, %v816_v29 }
 0x22b   : > { %v800_v33 = vrot.slane %v799_v30, 4  ;;  %v819_v34 = vrot.slane %v818_v31, 4 }
 0x22d   : > { %v801_v35 = vadd.f32 %v800_v33, %v799_v30  ;;  %v820_v36 = vadd.f32 %v819_v34, %v818_v31 }
 0x22f   : > { %v802_v38 = vrot.slane %v801_v35, 2  ;;  %v821_v39 = vrot.slane %v820_v36, 2 }
 0x231   : > { %v803_v40 = vadd.f32 %v802_v38, %v801_v35  ;;  %v822_v41 = vadd.f32 %v821_v39, %v820_v36 }
 0x233   : > { %v804_v43 = vrot.slane %v803_v40, 1  ;;  %v823_v44 = vrot.slane %v822_v41, 1 }
 0x235   : > { %v805_v46 = vadd.f32 %v804_v43, %v803_v40  ;;  %v824_v47 = vadd.f32 %v823_v44, %v822_v41 }
 0x237   : > { %v825_v49 = vadd.f32 %v824_v47, %v805_v46 }
 0x239   : > { %v835_v50 = vadd.f32 %v834_v48, %v825_v49 }
 0x23b   : > { %836 = vst [vmem:[%s339_s26] sm:$0x1] %v835_v50 }
 0x23c   : > { %1147 = shalt.err (!%p1144_p3)
}
 0x23d   : > { %s1148_s22 = scalar_lea.hbm %s1450_s30, 16  ;;  %s1152_s25 = scalar_lea.hbm %s1501_s9, 48 }
 0x23e   : > { %p1149_p4 = scmp.ne.s32.totalorder %s1450_s30, %s1148_s22  ;;  %p1153_p9 = scmp.lt.u32.totalorder %s1450_s30, %s1501_s9 }
 0x23f   : > { %p1154_p10 = scmp.lt.u32.totalorder %s1152_s25, %s1148_s22  ;;  %p1156_p12 = scmp.lt.u32.totalorder %s1148_s22, %s1450_s30 }
 0x240   : > { %p1150_p7 = pnand %p1149_p4, %p1288_p5 }
 0x241   : > { %p1155_p11 = por %p1154_p10, %p1153_p9 }
 0x242   : > { %p1151_p8 = pneg %p1150_p7 }
 0x243   : > { %p1157_p13 = por %p1156_p12, %p1155_p11 }
 0x245   : > { %p1158_p0 = pnand %p1157_p13, %p1151_p8 }
 0x247   : > { %1161 = shalt.err (!%p1158_p0)
}
 0x248   : > { %1092 = dma.vmem_to_hbm [thread:$0]  (%p1288_p5), %s1452_s27, 16, %s1450_s30, %s838_s10  }
 0x249 PF: > { %p1098_p1 = scmp.ge.s32.totalorder %s1196_s14, 2  ;;  %s862_s29 = sand.u32 1, %s1184_s11  }
 0x24a   : > { %s863_s8 = scalar_lea.sflag [#allocation4], %s862_s29 }
 0x24b   : > { %p1095_p2 = pnand %p1098_p1, %p1292_p6 }
 0x24d   : > { %1179 = dma.done.wait (!%p1095_p2), %s863_s8, 16  }
 0x24e   : > { %1181 = vsyncadd (!%p1095_p2), %s863_s8, 4294967280  ;;  %p21_p3 = scmp.ge.s32.totalorder %s1276_s16, 5   ;;  %s1506_s11 = smov %s1188_s12 }
 0x24f   : > { %s1507_s12 = smov %s1192_s13  ;;  %s1508_s13 = smov %s1286_s19 }
 0x250   : > { %s1509_s14 = smov %s1276_s16  ;;  %23 = sbr.rel (!%p21_p3) target bundleno = 6 (0x6), region = 91 }
 0x257   :  { %867 = vsyncpa [#allocation4], 1 }
 0x258   :  { %869 = vsyncpa [#allocation4 + $0x1], 1 }

</bundles_post_ra>
